<compile_context>
chip_gen: v6e
topology: v6e:2x2x1
jax: 0.10.0
libtpu: 0.0.40
codegen_flags: <defaults>
</compile_context>

<pallas_src>
import functools
import inspect

import jax
import jax.numpy as jnp
from jax.experimental import pallas as pl
from jax.experimental.pallas import tpu as pltpu


# --------------------------------------------------------------------------- #
# Pallas kernel: encode TB images per grid step (pooling already done outside).
# --------------------------------------------------------------------------- #
def _encode_image_kernel(pooled_ref,   # (TB, Kp) bf16  mean-pooled patch pixels
                         w_embed_ref,  # (Kp, D)  bf16  patch-embed weight
                         b_embed_ref,  # (1, D)   f32   patch-embed bias
                         ln_g_ref,     # (1, D)   f32   layernorm gamma
                         ln_b_ref,     # (1, D)   f32   layernorm beta
                         w_proj_ref,   # (D, E)   bf16  projection weight
                         b_proj_ref,   # (1, E)   f32   projection bias
                         out_ref):     # (TB, E)  f32   image embeddings
    # Patch embedding on the pooled rows (bf16 MXU inputs, f32 accumulation).
    emb = jnp.dot(pooled_ref[...], w_embed_ref[...],
                  preferred_element_type=jnp.float32)                 # (TB, D)
    emb = emb + b_embed_ref[...]

    # LayerNorm over the feature dim (f32).
    mu = jnp.mean(emb, axis=-1, keepdims=True)
    var = jnp.mean((emb - mu) ** 2, axis=-1, keepdims=True)
    normed = (emb - mu) * jax.lax.rsqrt(var + 1e-5)
    normed = normed * ln_g_ref[...] + ln_b_ref[...]                   # (TB, D)

    # Projection to the 512-dim CLIP embedding space (bf16 MXU, f32 acc).
    out = jnp.dot(normed.astype(jnp.bfloat16), w_proj_ref[...],
                  preferred_element_type=jnp.float32)                 # (TB, E)
    out_ref[...] = out + b_proj_ref[...]


# --------------------------------------------------------------------------- #
# Host-side helpers.
# --------------------------------------------------------------------------- #
def _round_up(x, m):
    return ((x + m - 1) // m) * m


def _mean_pool_patches(x_nchw, patch):
    """(N, C, H, W) -> (N, C*patch*patch): mean over the (H/p, W/p) patch grid,
    channel-major inside a patch (same K layout as flattened conv patches).
    Done in the wrapper so the kernel never streams the (N, P, K) tensor."""
    n, c, h, w = x_nchw.shape
    hp, wp = h // patch, w // patch
    x = x_nchw.reshape(n, c, hp, patch, wp, patch).astype(jnp.float32)
    return jnp.mean(x, axis=(2, 4)).reshape(n, c * patch * patch)


def _batch_tiling(n):
    """Return (tile, padded_n).  Full 256-row MXU tiles for large N, a single
    padded tile for small N, and an even step count when multi-step so the
    v7x megacore shards the parallel axis evenly."""
    if n <= 256:
        tb = max(8, _round_up(n, 8))
        return tb, tb
    tb = 256
    steps = pl.cdiv(n, tb)
    if steps % 2:
        steps += 1
    return tb, steps * tb


def _vmem_limit_bytes(tb, k_pad, d, e):
    """Scoped-VMEM request: actual block/weight need + headroom, capped at
    ~75% of this generation's physical VMEM (v7x only has 64 MiB)."""
    need = (2 * tb * k_pad * 2        # double-buffered pooled block (bf16)
            + 2 * tb * e * 4          # double-buffered output block (f32)
            + k_pad * d * 2           # w_embed (bf16, single-buffered)
            + d * e * 2               # w_proj  (bf16, single-buffered)
            + (3 * d + e) * 4)        # biases / LN params (f32)
    limit = max(need + (8 << 20), 16 << 20)
    try:
        cap = int(pltpu.get_tpu_info().vmem_capacity_bytes) * 3 // 4
    except Exception:
        cap = 48 << 20
    return int(min(limit, cap))


# Single-buffer grid-invariant operands when the installed JAX supports it.
if (hasattr(pl, "Buffered")
        and "pipeline_mode" in inspect.signature(pl.BlockSpec).parameters):
    _CONST_SPEC_KW = {"pipeline_mode": pl.Buffered(1)}
else:  # older JAX: fall back to default double-buffering
    _CONST_SPEC_KW = {}


# --------------------------------------------------------------------------- #
# Forward pass (equivalent of CLIPimf.forward).
# --------------------------------------------------------------------------- #
@functools.partial(jax.jit, static_argnames=("patch",))
def clip_imf_forward(x, params, patch):
    # _flatten: collapse any leading dims down to (N, C, H, W).
    if x.ndim >= 5:
        x = x.reshape((-1,) + x.shape[-3:])

    w_embed, b_embed, ln_g, ln_b, w_proj, b_proj = params
    d = w_embed.shape[1]
    e = w_proj.shape[1]

    # Patch mean-pool hoisted out of the kernel (P-fold less kernel DMA).
    pooled = _mean_pool_patches(x, patch)              # (N, K) f32
    n, k = pooled.shape

    # Lane-align K by zero-padding the (tiny) pooled array + w_embed rows: exact.
    k_pad = _round_up(k, 128)
    if k_pad != k:
        pooled = jnp.pad(pooled, ((0, 0), (0, k_pad - k)))
        w_embed = jnp.pad(w_embed, ((0, k_pad - k), (0, 0)))

    # Batch tiling at MXU width; pad N (padded rows are cheap and sliced off).
    tb, n_pad = _batch_tiling(n)
    if n_pad != n:
        pooled = jnp.pad(pooled, ((0, n_pad - n), (0, 0)))

    # bf16 matmul operands, f32 accumulation inside the kernel.
    pooled_bf = pooled.astype(jnp.bfloat16)
    w_embed_bf = w_embed.astype(jnp.bfloat16)
    w_proj_bf = w_proj.astype(jnp.bfloat16)

    out = pl.pallas_call(
        _encode_image_kernel,
        out_shape=jax.ShapeDtypeStruct((n_pad, e), jnp.float32),
        grid_spec=pltpu.PrefetchScalarGridSpec(
            num_scalar_prefetch=0,
            grid=(n_pad // tb,),
            in_specs=[
                pl.BlockSpec((tb, k_pad), lambda i: (i, 0)),                    # pooled
                pl.BlockSpec((k_pad, d), lambda i: (0, 0), **_CONST_SPEC_KW),   # w_embed
                pl.BlockSpec((1, d), lambda i: (0, 0), **_CONST_SPEC_KW),       # b_embed
                pl.BlockSpec((1, d), lambda i: (0, 0), **_CONST_SPEC_KW),       # ln_g
                pl.BlockSpec((1, d), lambda i: (0, 0), **_CONST_SPEC_KW),       # ln_b
                pl.BlockSpec((d, e), lambda i: (0, 0), **_CONST_SPEC_KW),       # w_proj
                pl.BlockSpec((1, e), lambda i: (0, 0), **_CONST_SPEC_KW),       # b_proj
            ],
            out_specs=pl.BlockSpec((tb, e), lambda i: (i, 0)),  # lane/sublane-dense slab
        ),
        compiler_params=pltpu.CompilerParams(
            dimension_semantics=("parallel",),
            vmem_limit_bytes=_vmem_limit_bytes(tb, k_pad, d, e),
        ),
    )(pooled_bf, w_embed_bf, b_embed, ln_g, ln_b, w_proj_bf, b_proj)

    return out[:n]


# --------------------------------------------------------------------------- #
# Pure-JAX f32 reference with the ORIGINAL op order (embed every patch, pool).
# --------------------------------------------------------------------------- #
def _extract_patches(x_nchw, patch):
    n, c, h, w = x_nchw.shape
    hp, wp = h // patch, w // patch
    x = x_nchw.reshape(n, c, hp, patch, wp, patch)
    x = jnp.transpose(x, (0, 2, 4, 1, 3, 5))          # (N, hp, wp, C, p, p)
    return x.reshape(n, hp * wp, c * patch * patch)   # (N, P, K)


def clip_imf_reference(x, params, patch):
    if x.ndim >= 5:
        x = x.reshape((-1,) + x.shape[-3:])
    x = x.astype(jnp.float32)
    patches = _extract_patches(x, patch)
    w_embed, b_embed, ln_g, ln_b, w_proj, b_proj = params
    emb = patches @ w_embed + b_embed[None]                     # (N, P, D)
    pooled = emb.mean(axis=1)                                   # (N, D)
    mu = pooled.mean(axis=-1, keepdims=True)
    var = ((pooled - mu) ** 2).mean(axis=-1, keepdims=True)
    normed = (pooled - mu) * jax.lax.rsqrt(var + 1e-5) * ln_g + ln_b
    return normed @ w_proj + b_proj


def init_params(key, c, patch, hidden, embed_dim):
    """Deterministic synthetic encoder parameters (no checkpoint loading)."""
    k = c * patch * patch
    k1, k2, k3, k4, k5 = jax.random.split(key, 5)
    w_embed = jax.random.normal(k1, (k, hidden), jnp.float32) * 0.02
    b_embed = jax.random.normal(k4, (1, hidden), jnp.float32) * 0.01
    ln_g = jnp.ones((1, hidden), jnp.float32)
    ln_b = jax.random.normal(k5, (1, hidden), jnp.float32) * 0.01
    w_proj = jax.random.normal(k2, (hidden, embed_dim), jnp.float32) * 0.02
    b_proj = jax.random.normal(k3, (1, embed_dim), jnp.float32) * 0.01
    return (w_embed, b_embed, ln_g, ln_b, w_proj, b_proj)


if __name__ == "__main__":
    B, T, C, H, W = 2, 8, 3, 16, 16          # 5-D input exercises _flatten; N = 16
    PATCH = 8                                # -> P = 4 patches, K = 192 (pooled pads to 256)
    HIDDEN = 128
    EMBED = 512                              # CLIPimf.output_size

    key = jax.random.PRNGKey(0)
    kx, kp = jax.random.split(key)
    x = jax.random.normal(kx, (B, T, C, H, W), jnp.float32)
    params = init_params(kp, C, PATCH, HIDDEN, EMBED)

    out = clip_imf_forward(x, params, PATCH)
    out = jax.block_until_ready(out)

    ref = clip_imf_reference(x, params, PATCH)
    assert out.shape == (B * T, EMBED), out.shape
    # bf16 matmul operands + pool-before-embed rewrite change fp rounding
    # slightly vs the all-f32 reference; widen tolerance accordingly.
    assert jnp.allclose(out, ref, atol=2e-2, rtol=2e-2), "mismatch vs reference"

    print("KERNEL_OK")
</pallas_src>

<mosaic_0001>
module attributes {stable_mosaic.version = 11 : i64} {
  func.func @_encode_image_kernel(%arg0: i32, %arg1: memref<16x256xbf16, #tpu.memory_space<vmem>>, %arg2: memref<256x128xbf16, #tpu.memory_space<vmem>>, %arg3: memref<1x128xf32, #tpu.memory_space<vmem>>, %arg4: memref<1x128xf32, #tpu.memory_space<vmem>>, %arg5: memref<1x128xf32, #tpu.memory_space<vmem>>, %arg6: memref<128x512xbf16, #tpu.memory_space<vmem>>, %arg7: memref<1x512xf32, #tpu.memory_space<vmem>>, %arg8: memref<16x512xf32, #tpu.memory_space<vmem>>) attributes {dimension_semantics = [#tpu.dimension_semantics<parallel>], iteration_bounds = array<i64: 1>, scalar_prefetch = 0 : i64, scratch_operands = 0 : i64, tpu.core_type = #tpu.core_type<tc>, window_params = [{transform_indices = @transform_0, window_bounds = array<i64: 16, 256>}, {pipeline_mode = #tpu.pipeline_mode<synchronous>, transform_indices = @transform_1, window_bounds = array<i64: 256, 128>}, {pipeline_mode = #tpu.pipeline_mode<synchronous>, transform_indices = @transform_2, window_bounds = array<i64: 1, 128>}, {pipeline_mode = #tpu.pipeline_mode<synchronous>, transform_indices = @transform_3, window_bounds = array<i64: 1, 128>}, {pipeline_mode = #tpu.pipeline_mode<synchronous>, transform_indices = @transform_4, window_bounds = array<i64: 1, 128>}, {pipeline_mode = #tpu.pipeline_mode<synchronous>, transform_indices = @transform_5, window_bounds = array<i64: 128, 512>}, {pipeline_mode = #tpu.pipeline_mode<synchronous>, transform_indices = @transform_6, window_bounds = array<i64: 1, 512>}, {transform_indices = @transform_7, window_bounds = array<i64: 16, 512>}]} {
    %c0 = arith.constant 0 : index
    %c0_0 = arith.constant 0 : index
    %0 = vector.load %arg1[%c0, %c0_0] : memref<16x256xbf16, #tpu.memory_space<vmem>>, vector<16x256xbf16>
    %c0_1 = arith.constant 0 : index
    %c0_2 = arith.constant 0 : index
    %1 = vector.load %arg2[%c0_1, %c0_2] : memref<256x128xbf16, #tpu.memory_space<vmem>>, vector<256x128xbf16>
    %cst = arith.constant dense<0.000000e+00> : vector<16x128xf32>
    %2 = tpu.matmul %0, %1, %cst {dimension_numbers = #tpu.dot_dimension_numbers<[1], [0], [0], [1], [0, 0, 1, 1], [], []>} : vector<16x256xbf16>, vector<256x128xbf16>, vector<16x128xf32> -> vector<16x128xf32>
    %c0_3 = arith.constant 0 : index
    %c0_4 = arith.constant 0 : index
    %3 = vector.load %arg3[%c0_3, %c0_4] : memref<1x128xf32, #tpu.memory_space<vmem>>, vector<1x128xf32>
    %4 = vector.broadcast %3 : vector<1x128xf32> to vector<16x128xf32>
    %5 = arith.addf %2, %4 : vector<16x128xf32>
    %cst_5 = arith.constant dense<0.000000e+00> : vector<16xf32>
    %6 = vector.multi_reduction <add>, %5, %cst_5 [1] : vector<16x128xf32> to vector<16xf32>
    %7 = vector.shape_cast %6 : vector<16xf32> to vector<16x1xf32>
    %cst_6 = arith.constant 1.280000e+02 : f32
    %8 = vector.broadcast %cst_6 : f32 to vector<16x1xf32>
    %9 = arith.divf %7, %8 : vector<16x1xf32>
    %10 = vector.broadcast %9 : vector<16x1xf32> to vector<16x128xf32>
    %11 = arith.subf %5, %10 : vector<16x128xf32>
    %12 = arith.mulf %11, %11 : vector<16x128xf32>
    %cst_7 = arith.constant dense<0.000000e+00> : vector<16xf32>
    %13 = vector.multi_reduction <add>, %12, %cst_7 [1] : vector<16x128xf32> to vector<16xf32>
    %14 = vector.shape_cast %13 : vector<16xf32> to vector<16x1xf32>
    %cst_8 = arith.constant 1.280000e+02 : f32
    %15 = vector.broadcast %cst_8 : f32 to vector<16x1xf32>
    %16 = arith.divf %14, %15 : vector<16x1xf32>
    %17 = vector.broadcast %9 : vector<16x1xf32> to vector<16x128xf32>
    %18 = arith.subf %5, %17 : vector<16x128xf32>
    %cst_9 = arith.constant 9.99999974E-6 : f32
    %19 = vector.broadcast %cst_9 : f32 to vector<16x1xf32>
    %20 = arith.addf %16, %19 : vector<16x1xf32>
    %21 = math.rsqrt %20 : vector<16x1xf32>
    %22 = vector.broadcast %21 : vector<16x1xf32> to vector<16x128xf32>
    %23 = arith.mulf %18, %22 : vector<16x128xf32>
    %c0_10 = arith.constant 0 : index
    %c0_11 = arith.constant 0 : index
    %24 = vector.load %arg4[%c0_10, %c0_11] : memref<1x128xf32, #tpu.memory_space<vmem>>, vector<1x128xf32>
    %25 = vector.broadcast %24 : vector<1x128xf32> to vector<16x128xf32>
    %26 = arith.mulf %23, %25 : vector<16x128xf32>
    %c0_12 = arith.constant 0 : index
    %c0_13 = arith.constant 0 : index
    %27 = vector.load %arg5[%c0_12, %c0_13] : memref<1x128xf32, #tpu.memory_space<vmem>>, vector<1x128xf32>
    %28 = vector.broadcast %27 : vector<1x128xf32> to vector<16x128xf32>
    %29 = arith.addf %26, %28 : vector<16x128xf32>
    %30 = arith.truncf %29 : vector<16x128xf32> to vector<16x128xbf16>
    %c0_14 = arith.constant 0 : index
    %c0_15 = arith.constant 0 : index
    %31 = vector.load %arg6[%c0_14, %c0_15] : memref<128x512xbf16, #tpu.memory_space<vmem>>, vector<128x512xbf16>
    %cst_16 = arith.constant dense<0.000000e+00> : vector<16x512xf32>
    %32 = tpu.matmul %30, %31, %cst_16 {dimension_numbers = #tpu.dot_dimension_numbers<[1], [0], [0], [1], [0, 0, 1, 1], [], []>} : vector<16x128xbf16>, vector<128x512xbf16>, vector<16x512xf32> -> vector<16x512xf32>
    %c0_17 = arith.constant 0 : index
    %c0_18 = arith.constant 0 : index
    %33 = vector.load %arg7[%c0_17, %c0_18] : memref<1x512xf32, #tpu.memory_space<vmem>>, vector<1x512xf32>
    %34 = vector.broadcast %33 : vector<1x512xf32> to vector<16x512xf32>
    %35 = arith.addf %32, %34 : vector<16x512xf32>
    %c0_19 = arith.constant 0 : index
    %c0_20 = arith.constant 0 : index
    %36 = vector.load %arg8[%c0_19, %c0_20] : memref<16x512xf32, #tpu.memory_space<vmem>>, vector<16x512xf32>
    tpu.vector_store %arg8[%c0_19, %c0_20], %35 {strides = array<i32>} : memref<16x512xf32, #tpu.memory_space<vmem>>, vector<16x512xf32>,
    return
  }
  func.func @transform_0(%arg0: i32) -> (i32, i32) {
    %c0_i32 = arith.constant 0 : i32
    %c0_i32_0 = arith.constant 0 : i32
    return %arg0, %c0_i32 : i32, i32
  }
  func.func @transform_1(%arg0: i32) -> (i32, i32) {
    %c0_i32 = arith.constant 0 : i32
    %c0_i32_0 = arith.constant 0 : i32
    %c0_i32_1 = arith.constant 0 : i32
    return %c0_i32, %c0_i32_0 : i32, i32
  }
  func.func @transform_2(%arg0: i32) -> (i32, i32) {
    %c0_i32 = arith.constant 0 : i32
    %c0_i32_0 = arith.constant 0 : i32
    %c0_i32_1 = arith.constant 0 : i32
    return %c0_i32, %c0_i32_0 : i32, i32
  }
  func.func @transform_3(%arg0: i32) -> (i32, i32) {
    %c0_i32 = arith.constant 0 : i32
    %c0_i32_0 = arith.constant 0 : i32
    %c0_i32_1 = arith.constant 0 : i32
    return %c0_i32, %c0_i32_0 : i32, i32
  }
  func.func @transform_4(%arg0: i32) -> (i32, i32) {
    %c0_i32 = arith.constant 0 : i32
    %c0_i32_0 = arith.constant 0 : i32
    %c0_i32_1 = arith.constant 0 : i32
    return %c0_i32, %c0_i32_0 : i32, i32
  }
  func.func @transform_5(%arg0: i32) -> (i32, i32) {
    %c0_i32 = arith.constant 0 : i32
    %c0_i32_0 = arith.constant 0 : i32
    %c0_i32_1 = arith.constant 0 : i32
    return %c0_i32, %c0_i32_0 : i32, i32
  }
  func.func @transform_6(%arg0: i32) -> (i32, i32) {
    %c0_i32 = arith.constant 0 : i32
    %c0_i32_0 = arith.constant 0 : i32
    %c0_i32_1 = arith.constant 0 : i32
    return %c0_i32, %c0_i32_0 : i32, i32
  }
  func.func @transform_7(%arg0: i32) -> (i32, i32) {
    %c0_i32 = arith.constant 0 : i32
    %c0_i32_0 = arith.constant 0 : i32
    return %arg0, %c0_i32 : i32, i32
  }
}

</mosaic_0001>

<bundles_post_ra>
// kernel: clip_imf_forward.1
= control target key start
LH: loop header
LB: loop body
LE: loop exit
PB: predicated region body
PF: predicated region fallthrough
CT: control target
= control target key end

     0   :  { %s973_s0 = inlined_call_operand.vmem [shape: bf16[16,256], index: 0, kind: input, shape index: {}]   ;;  %s974_s1 = inlined_call_operand.vmem [shape: bf16[256,128], index: 1, kind: input, shape index: {}]   ;;  %s975_s2 = inlined_call_operand.vmem [shape: f32[1,128], index: 2, kind: input, shape index: {}]   ;;  %s976_s3 = inlined_call_operand.vmem [shape: f32[1,128], index: 3, kind: input, shape index: {}]   ;;  %s977_s4 = inlined_call_operand.vmem [shape: f32[1,128], index: 4, kind: input, shape index: {}]   ;;  %s978_s5 = inlined_call_operand.vmem [shape: bf16[128,512], index: 5, kind: input, shape index: {}]   ;;  %s979_s6 = inlined_call_operand.vmem [shape: f32[1,512], index: 6, kind: input, shape index: {}]   ;;  %s980_s7 = inlined_call_operand.hbm [shape: f32[16,512], index: 7, kind: output, shape index: {}]  }
   0x1   :  { %v661_v0 = vld [vmem:[%s974_s1 + $0x78] sm:$0xff]   ;;  %v663_v2 = vld [vmem:[%s974_s1 + $0x70] sm:$0xff]   ;;  %v665_v4 = vld [vmem:[%s974_s1 + $0x68] sm:$0xff]  }
   0x2   :  { %v662_v1 = vld [vmem:[%s974_s1 + $0x38] sm:$0xff]   ;;  %635 = vmatprep.subr.bf16.mxu0 %v661_v0  ;;  %v664_v3 = vld [vmem:[%s974_s1 + $0x30] sm:$0xff]   ;;  %v666_v5 = vld [vmem:[%s974_s1 + $0x28] sm:$0xff]  }
   0x3   :  { %636 = vmatpush3.bf16.msra.mxu0 %v662_v1  ;;  %v667_v6 = vld [vmem:[%s974_s1 + $0x60] sm:$0xff]   ;;  %v669_v8 = vld [vmem:[%s974_s1 + $0x58] sm:$0xff]   ;;  %v671_v10 = vld [vmem:[%s974_s1 + $0x50] sm:$0xff]  }
   0x4   :  { %637 = vmatprep.subr.bf16.mxu0 %v663_v2  ;;  %v668_v7 = vld [vmem:[%s974_s1 + $0x20] sm:$0xff]   ;;  %v670_v9 = vld [vmem:[%s974_s1 + $0x18] sm:$0xff]   ;;  %v672_v11 = vld [vmem:[%s974_s1 + $0x10] sm:$0xff]  }
   0x5   :  { %v679_v12 = vld [vmem:[%s973_s0 + $0x4] ss:$8 sps:$4 sm:$0xff]  }
   0x6   :  { %v673_v13 = vld [vmem:[%s974_s1 + $0x48] sm:$0xff]   ;;  %207 = vmatprep.mubr.bf16.mxu0 %v679_v12  ;;  %v675_v15 = vld [vmem:[%s974_s1 + $0x40] sm:$0xff]  }
   0x7   :  { %638 = vmatpush3.bf16.msra.mxu0 %v664_v3  ;;  %v674_v14 = vld [vmem:[%s974_s1 + $0x8] sm:$0xff]   ;;  %v676_v16 = vld [vmem:[%s974_s1] sm:$0xff]  }
   0x8   :  { %639 = vmatprep.subr.bf16.mxu0 %v665_v4 }
   0xb   :  { %640 = vmatpush3.bf16.msra.mxu0 %v666_v5 }
   0xc   :  { %641 = vmatprep.subr.bf16.mxu0 %v667_v6 }
   0xf   :  { %642 = vmatpush3.bf16.msra.mxu0 %v668_v7 }
  0x10   :  { %643 = vmatprep.subr.bf16.mxu0 %v669_v8 }
  0x13   :  { %644 = vmatpush3.bf16.msra.mxu0 %v670_v9 }
  0x14   :  { %645 = vmatprep.subr.bf16.mxu0 %v671_v10 }
  0x17   :  { %646 = vmatpush3.bf16.msra.mxu0 %v672_v11 }
  0x18   :  { %647 = vmatprep.subr.bf16.mxu0 %v673_v13 }
  0x1b   :  { %648 = vmatpush3.bf16.msra.mxu0 %v674_v14 }
  0x1c   :  { %649 = vmatprep.subr.bf16.mxu0 %v675_v15 }
  0x1d   :  { %12 = vsyncpa [#allocation3], 0  ;;  %v677_v17 = vld [vmem:[%s973_s0] ss:$8 sps:$4 sm:$0xff]   ;;  %v680_v27 = vld [vmem:[%s978_s5 + $0xe4] ss:$16 sps:$4 sm:$0xff]  }
  0x1e   :  { %v582_v20 = vld [vmem:[%s975_s2] ss:$0 sm:$0xff]  ;;  %v682_v28 = vld [vmem:[%s978_s5 + $0xe8] ss:$16 sps:$4 sm:$0xff]   ;;  %v684_v29 = vld [vmem:[%s978_s5 + $0xec] ss:$16 sps:$4 sm:$0xff]   ;;  %472 = vmatprep.subr.bf16.mxu1 %v680_v27 }
  0x1f   :  { %650 = vmatpush3.bf16.msra.mxu0 %v676_v16  ;;  %v685_v30 = vld [vmem:[%s978_s5 + $0xe0] ss:$16 sps:$4 sm:$0xff]   ;;  %v686_v39 = vld [vmem:[%s978_s5 + $0xc4] ss:$16 sps:$4 sm:$0xff]   ;;  %v690_v40 = vld [vmem:[%s978_s5 + $0xcc] ss:$16 sps:$4 sm:$0xff]  }
  0x20   :  { %515 = vmatprep.subr.bf16.mxu0 %v684_v29  ;;  %473 = vmatpush1.bf16.msra.mxu1 %v685_v30  ;;  %v688_v41 = vld [vmem:[%s978_s5 + $0xc8] ss:$16 sps:$4 sm:$0xff]   ;;  %v691_v42 = vld [vmem:[%s978_s5 + $0xc0] ss:$16 sps:$4 sm:$0xff]   ;;  %v692_v43 = vld [vmem:[%s978_s5 + $0xa4] ss:$16 sps:$4 sm:$0xff]  }
  0x21   :  { %474 = vmatprep.subr.bf16.mxu1 %v686_v39  ;;  %v696_v44 = vld [vmem:[%s978_s5 + $0xac] ss:$16 sps:$4 sm:$0xff]   ;;  %v694_v45 = vld [vmem:[%s978_s5 + $0xa8] ss:$16 sps:$4 sm:$0xff]   ;;  %v697_v46 = vld [vmem:[%s978_s5 + $0xa0] ss:$16 sps:$4 sm:$0xff]  }
  0x22   :  { %208 = vmatmul.mubr.bf16.vlgmr.msra.gmra.mxu0 %v677_v17  ;;  %v698_v47 = vld [vmem:[%s978_s5 + $0x84] ss:$16 sps:$4 sm:$0xff]   ;;  %v700_v48 = vld [vmem:[%s978_s5 + $0x88] ss:$16 sps:$4 sm:$0xff]   ;;  %v702_v49 = vld [vmem:[%s978_s5 + $0x8c] ss:$16 sps:$4 sm:$0xff]  }
  0x23   :  { %516 = vmatpush1.bf16.msra.mxu0 %v682_v28  ;;  %v703_v50 = vld [vmem:[%s978_s5 + $0x80] ss:$16 sps:$4 sm:$0xff]   ;;  %v704_v51 = vld [vmem:[%s978_s5 + $0x64] ss:$16 sps:$4 sm:$0xff]   ;;  %v708_v52 = vld [vmem:[%s978_s5 + $0x6c] ss:$16 sps:$4 sm:$0xff]  }
  0x24   :  { %517 = vmatprep.subr.bf16.mxu0 %v690_v40  ;;  %475 = vmatpush1.bf16.msra.mxu1 %v691_v42  ;;  %v706_v53 = vld [vmem:[%s978_s5 + $0x68] ss:$16 sps:$4 sm:$0xff]   ;;  %v709_v54 = vld [vmem:[%s978_s5 + $0x60] ss:$16 sps:$4 sm:$0xff]   ;;  %v710_v55 = vld [vmem:[%s978_s5 + $0x44] ss:$16 sps:$4 sm:$0xff]  }
  0x25   :  { %476 = vmatprep.subr.bf16.mxu1 %v692_v43  ;;  %v714_v56 = vld [vmem:[%s978_s5 + $0x4c] ss:$16 sps:$4 sm:$0xff]   ;;  %v712_v57 = vld [vmem:[%s978_s5 + $0x48] ss:$16 sps:$4 sm:$0xff]   ;;  %v715_v58 = vld [vmem:[%s978_s5 + $0x40] ss:$16 sps:$4 sm:$0xff]  }
  0x26   :  { %v716_v59 = vld [vmem:[%s978_s5 + $0x24] ss:$16 sps:$4 sm:$0xff]   ;;  %v720_v60 = vld [vmem:[%s978_s5 + $0x2c] ss:$16 sps:$4 sm:$0xff]   ;;  %v754_v61 = vmov 0  }
  0x27   :  { %518 = vmatpush1.bf16.msra.mxu0 %v688_v41  ;;  %504 = vmatprep.mubr.bf16.mxu1 %v754_v61  ;;  %v718_v62 = vld [vmem:[%s978_s5 + $0x28] ss:$16 sps:$4 sm:$0xff]   ;;  %v721_v63 = vld [vmem:[%s978_s5 + $0x20] ss:$16 sps:$4 sm:$0xff]   ;;  %v722_v0 = vld [vmem:[%s978_s5 + $0x4] ss:$16 sps:$4 sm:$0xff]  }
  0x28   :  { %519 = vmatprep.subr.bf16.mxu0 %v696_v44  ;;  %477 = vmatpush1.bf16.msra.mxu1 %v697_v46  ;;  %v726_v1 = vld [vmem:[%s978_s5 + $0xc] ss:$16 sps:$4 sm:$0xff]   ;;  %v724_v2 = vld [vmem:[%s978_s5 + $0x8] ss:$16 sps:$4 sm:$0xff]   ;;  %v727_v3 = vld [vmem:[%s978_s5] ss:$16 sps:$4 sm:$0xff]  }
  0x29   :  { %478 = vmatprep.subr.bf16.mxu1 %v698_v47  ;;  %547 = vmatprep.mubr.bf16.mxu0 %v754_v61  ;;  %v601_v12 = vld [vmem:[%s976_s3] ss:$0 sm:$0xff] }
  0x2a   :  { %v602_v16 = vld [vmem:[%s977_s4] ss:$0 sm:$0xff]  ;;  %s755_s4 = smov [#allocation2]  }
  0x2b   :  { %520 = vmatpush1.bf16.msra.mxu0 %v694_v45  ;;  %s571_s29 = sshll.u32 %s755_s4, 4  ;;  %s572_s29 = int_to_ptr.vmem [resolvable:$true] %s571_s29 }
  0x2c   :  { %521 = vmatprep.subr.bf16.mxu0 %v702_v49  ;;  %479 = vmatpush1.bf16.msra.mxu1 %v703_v50  ;;  %p737_p1 = scmp.lt.s32.totalorder %s572_s29, %s572_s29 }
  0x2d   :  { %480 = vmatprep.subr.bf16.mxu1 %v704_v51 }
  0x2f   :  { %522 = vmatpush1.bf16.msra.mxu0 %v700_v48 }
  0x30   :  { %523 = vmatprep.subr.bf16.mxu0 %v708_v52  ;;  %481 = vmatpush1.bf16.msra.mxu1 %v709_v54 }
  0x31   :  { %482 = vmatprep.subr.bf16.mxu1 %v710_v55 }
  0x33   :  { %524 = vmatpush1.bf16.msra.mxu0 %v706_v53 }
  0x34   :  { %525 = vmatprep.subr.bf16.mxu0 %v714_v56  ;;  %483 = vmatpush1.bf16.msra.mxu1 %v715_v58 }
  0x35   :  { %484 = vmatprep.subr.bf16.mxu1 %v716_v59 }
  0x37   :  { %526 = vmatpush1.bf16.msra.mxu0 %v712_v57 }
  0x38   :  { %527 = vmatprep.subr.bf16.mxu0 %v720_v60  ;;  %485 = vmatpush1.bf16.msra.mxu1 %v721_v63 }
  0x39   :  { %486 = vmatprep.subr.bf16.mxu1 %v722_v0 }
  0x3b   :  { %528 = vmatpush1.bf16.msra.mxu0 %v718_v62 }
  0x3c   :  { %529 = vmatprep.subr.bf16.mxu0 %v726_v1  ;;  %487 = vmatpush1.bf16.msra.mxu1 %v727_v3 }
  0x3f   :  { %530 = vmatpush1.bf16.msra.mxu0 %v724_v2 }
  0xe2   :  { %v651_v18 = vpop.f32.mrf.mxu0 }
  0xe4   :  { %v652_v19 = vpop.f32.mrf.mxu0 }
  0xe5   :  { %v653_v21 = vadd.f32 %v652_v19, %v651_v18 }
  0xe6   :  { %v654_v22 = vpop.f32.mrf.mxu0 }
  0xe7   :  { %v210_v23 = vadd.f32 %v653_v21, %v582_v20  ;;  %v292_v21 = vlaneseq }
  0xe8   :  { %v655_v24 = vpop.f32.mrf.mxu0 }
  0xe9   :  { %v656_v25 = vadd.f32 %v655_v24, %v654_v22  ;;  %216 = vadd.xlane.f32.xlu0 %v210_v23  ;;  %v293_v22 = vshrl.u32 %v292_v21, 7 }
  0xeb   :  { %v213_v26 = vadd.f32 %v656_v25, %v582_v20  ;;  %v302_v24 = vsub.s32 2, %v293_v22  ;;  %v290_v25 = vld [vmem:[%s979_s6] sm:$0xf]  ;;  %v306_v27 = vsub.s32 3, %v293_v22  ;;  %s732_s6 = scalar_lea.vmem %s572_s29, 1024 }
  0xec   :  { %p733_p0 = scmp.ne.s32.totalorder %s572_s29, %s732_s6  ;;  %p738_p2 = scmp.lt.s32.totalorder %s732_s6, %s732_s6 }
  0xed   :  { %218 = vadd.xlane.f32.xlu0 %v213_v26  ;;  %v303_v29 = vrot.slane %v290_v25, %v302_v24 }
  0xee   :  { %p739_p3 = por %p738_p2, %p737_p1 }
  0xf0   :  { %p740_p4 = pnand %p739_p3, %p733_p0 }
 0x172   :  { %v217_v31 = vpop.xlane.xlu0 %216 }
 0x173   :  { %v221_v32 = vmul.f32 0.0078125, %v217_v31  ;;  %v307_v31 = vrot.slane %v290_v25, %v306_v27 }
 0x175   :  { %v867_v33 = vsub.f32 %v210_v23, %v221_v32  ;;  %v294_v23 = vsub.s32 0, %v293_v22 }
 0x176   :  { %v219_v34 = vpop.xlane.xlu0 %218 }
 0x177   :  { %v222_v35 = vmul.f32 0.0078125, %v219_v34  ;;  %v225_v36 = vmul.f32 %v867_v33, %v867_v33  ;;  %v295_v28 = vrot.slane %v290_v25, %v294_v23 }
 0x179   :  { %v871_v37 = vsub.f32 %v213_v26, %v222_v35  ;;  %227 = vadd.xlane.f32.xlu1 %v225_v36  ;;  %v298_v26 = vsub.s32 1, %v293_v22 }
 0x17b   :  { %v226_v38 = vmul.f32 %v871_v37, %v871_v37  ;;  %v299_v30 = vrot.slane %v290_v25, %v298_v26 }
 0x17d   :  { %229 = vadd.xlane.f32.xlu1 %v226_v38 }
 0x202   :  { %v228_v4 = vpop.xlane.xlu1 %227 }
 0x203   :  { %v231_v5 = vmul.f32 0.0078125, %v228_v4 }
 0x205   :  { %v233_v6 = vadd.f32 1e-05, %v231_v5 }
 0x206   :  { %v230_v7 = vpop.xlane.xlu1 %229 }
 0x207   :  { %728 = vrsqrt.f32 %v233_v6  ;;  %v232_v8 = vmul.f32 0.0078125, %v230_v7 }
 0x209   :  { %v234_v9 = vadd.f32 1e-05, %v232_v8 }
 0x20b   :  { %730 = vrsqrt.f32 %v234_v9 }
 0x214   :  { %v729_v10 = vpop.eup %728 }
 0x215   :  { %v237_v11 = vmul.f32 %v729_v10, %v867_v33 }
 0x217   :  { %v246_v15 = vmul.f32 %v601_v12, %v237_v11 }
 0x218   :  { %v731_v13 = vpop.eup %730 }
 0x219   :  { %v238_v14 = vmul.f32 %v731_v13, %v871_v37  ;;  %v255_v18 = vadd.f32 %v602_v16, %v246_v15 }
 0x21b   :  { %v247_v17 = vmul.f32 %v601_v12, %v238_v14 }
 0x21d   :  { %v256_v19 = vadd.f32 %v602_v16, %v247_v17 }
 0x21f   :  { %v257_v20 = vpack.c.bf16 %v256_v19, %v255_v18 }
 0x221   :  { %505 = vmatmul.mubr.bf16.vlgmr.msra.gmra.mxu1 %v257_v20  ;;  %548 = vmatmul.mubr.bf16.vlgmr.msra.gmra.mxu0 %v257_v20 }
 0x2e1   :  { %v506_v32 = vpop.f32.mrf.mxu1  ;;  %v549_v33 = vpop.f32.mrf.mxu0 }
 0x2e2   :  { %v507_v34 = vadd.f32 %v506_v32, %v295_v28  ;;  %v550_v35 = vadd.f32 %v549_v33, %v303_v29 }
 0x2e3   :  { %v508_v36 = vpop.f32.mrf.mxu1  ;;  %v551_v37 = vpop.f32.mrf.mxu0 }
 0x2e4   :  { %558 = vst [vmem:[#allocation2] sm:$0xff] %v507_v34  ;;  %560 = vst [vmem:[#allocation2 + $0x10] sm:$0xff] %v550_v35  ;;  %v509_v38 = vadd.f32 %v508_v36, %v299_v30  ;;  %v552_v39 = vadd.f32 %v551_v37, %v307_v31 }
 0x2e5   :  { %v510_v40 = vpop.f32.mrf.mxu1  ;;  %v553_v41 = vpop.f32.mrf.mxu0 }
 0x2e6   :  { %559 = vst [vmem:[#allocation2 + $0x8] sm:$0xff] %v509_v38  ;;  %561 = vst [vmem:[#allocation2 + $0x18] sm:$0xff] %v552_v39  ;;  %v511_v42 = vadd.f32 %v510_v40, %v295_v28  ;;  %v554_v43 = vadd.f32 %v553_v41, %v303_v29 }
 0x2e7   :  { %v512_v44 = vpop.f32.mrf.mxu1  ;;  %v555_v45 = vpop.f32.mrf.mxu0 }
 0x2e8   :  { %562 = vst [vmem:[#allocation2 + $0x20] sm:$0xff] %v511_v42  ;;  %564 = vst [vmem:[#allocation2 + $0x30] sm:$0xff] %v554_v43  ;;  %v513_v46 = vadd.f32 %v512_v44, %v299_v30  ;;  %v556_v47 = vadd.f32 %v555_v45, %v307_v31 }
 0x2ea   :  { %563 = vst [vmem:[#allocation2 + $0x28] sm:$0xff] %v513_v46  ;;  %565 = vst [vmem:[#allocation2 + $0x38] sm:$0xff] %v556_v47 }
 0x2eb   :  { %743 = shalt.err (!%p740_p4)
}
 0x2ec   :  { %s756_s30 = smov 512   ;;  %s757_s8 = smov 32  }
 0x2ed   :  { %577 = dma.vmem_to_hbm [thread:$0]  %s572_s29, 1024, %s980_s7, [#allocation3], %s756_s30, %s756_s30, %s757_s8  }
 0x2ee   :  { %752 = dma.done.wait [#allocation3], 1024  }
 0x2ef   :  { %753 = vsyncadd [#allocation3], 4294966272 }
 0x2f0   :  { %581 = vsyncpa [#allocation3], 1 }

</bundles_post_ra>
